<compile_context>
chip_gen: v7x
topology: tpu7x:2x2x1
jax: 0.10.0
libtpu: 0.0.40
codegen_flags: <defaults>
</compile_context>

<pallas_src>
import numpy as np
import jax
import jax.numpy as jnp
from jax.experimental import pallas as pl
from jax.experimental.pallas import tpu as pltpu


def _make_split_kernel(col_bounds):
    """col_bounds: list of (static col start, static col width) per chunk."""

    def kernel(x_ref, *o_refs):
        x = x_ref[...]  # one VMEM tile of the lane-dense slab
        for (c0, w), o_ref in zip(col_bounds, o_refs):
            o_ref[...] = x[:, c0:c0 + w]

    return kernel


def split_pallas(x, split_size_or_sections, dim=0):
    """Pallas-backed equivalent of torch.split(x, split_size_or_sections, dim)."""
    nd = x.ndim
    d = dim if dim >= 0 else dim + nd
    assert 0 <= d < nd, "invalid dim"

    S = int(x.shape[d])
    if isinstance(split_size_or_sections, (int, np.integer)):
        ss = int(split_size_or_sections)
        assert ss > 0, "split_size must be positive"
        sizes = [ss] * (S // ss)
        if S % ss:
            sizes.append(S % ss)
    else:
        sizes = [int(s) for s in split_size_or_sections]
        assert sum(sizes) == S, "sections must sum to the dim size"

    lead = int(np.prod(x.shape[:d])) if d > 0 else 1
    trail = int(np.prod(x.shape[d + 1:])) if d + 1 < nd else 1
    row_elems = S * trail
    itemsize = jnp.dtype(x.dtype).itemsize
    row_bytes = row_elems * itemsize

    # Metadata-only: present the data as a lane-dense 2D slab (lead, S*trail).
    x2 = jnp.reshape(x, (lead, row_elems))

    # Static column range for each chunk inside the slab.
    col_bounds = []
    off = 0
    for s in sizes:
        col_bounds.append((off * trail, s * trail))
        off += s

    # Row tiling: keep each input tile <= ~4 MiB (safe for v7x's 64 MiB VMEM
    # with double-buffered in+out), tile rows multiple of 8 unless full-extent.
    target_tile_bytes = 4 * 1024 * 1024
    cap_rows = max(8, (target_tile_bytes // max(row_bytes, 1)) // 8 * 8)
    tile_rows = lead if lead <= cap_rows else int(cap_rows)
    grid = (pl.cdiv(lead, tile_rows),)
    # TODO(synk): for extremely wide rows (S*trail*itemsize >> 4 MiB) a second
    # (column) grid axis would be needed; not required for typical activations.

    kernel = _make_split_kernel(col_bounds)

    out_shape = tuple(
        jax.ShapeDtypeStruct((lead, w), x.dtype) for (_, w) in col_bounds
    )
    in_specs = [pl.BlockSpec((tile_rows, row_elems), lambda i: (i, 0))]
    out_specs = tuple(
        pl.BlockSpec((tile_rows, w), lambda i: (i, 0)) for (_, w) in col_bounds
    )

    tile_bytes = tile_rows * row_bytes
    vmem_limit = int(min(100 * 2**20, max(4 * 2**20, 6 * tile_bytes)))

    outs = pl.pallas_call(
        kernel,
        out_shape=out_shape,
        grid=grid,
        in_specs=in_specs,
        out_specs=out_specs,
        compiler_params=pltpu.CompilerParams(
            dimension_semantics=("parallel",),
            vmem_limit_bytes=vmem_limit,
        ),
        cost_estimate=pl.CostEstimate(
            flops=0,
            transcendentals=0,
            bytes_accessed=2 * x.size * itemsize,
        ),
    )(x2)

    # Metadata-only reshapes back to the user-visible chunk shapes.
    chunks = []
    for s, o in zip(sizes, outs):
        chunk_shape = tuple(x.shape[:d]) + (s,) + tuple(x.shape[d + 1:])
        chunks.append(jnp.reshape(o, chunk_shape))
    return tuple(chunks)


class Split:
    """JAX/Pallas mirror of the sparsebit Split qmodule (no quantization)."""

    def __init__(self, org_module=None, config=None):
        pass

    def __call__(self, x_in, *args, **kwargs):
        return split_pallas(x_in, *args, **kwargs)


if __name__ == "__main__":
    key = jax.random.PRNGKey(0)
    # NCHW input, small shapes: batch=2, channels=4, spatial=16x16
    x = jax.random.normal(key, (2, 4, 16, 16), dtype=jnp.float32)

    mod = Split()

    # Case 1: torch.split(x, 2, dim=1) -> two chunks of 2 channels each.
    out = mod(x, 2, dim=1)
    out = tuple(jax.block_until_ready(o) for o in out)
    assert isinstance(out, tuple) and len(out) == 2, len(out)
    ref = (x[:, 0:2], x[:, 2:4])
    for o, r in zip(out, ref):
        assert o.shape == r.shape, (o.shape, r.shape)
        assert o.dtype == x.dtype
        np.testing.assert_array_equal(np.asarray(o), np.asarray(r))

    # Case 2: explicit sections, torch.split(x, [1, 3], dim=1).
    out2 = mod(x, [1, 3], dim=1)
    out2 = tuple(jax.block_until_ready(o) for o in out2)
    ref2 = (x[:, 0:1], x[:, 1:4])
    assert len(out2) == 2
    for o, r in zip(out2, ref2):
        assert o.shape == r.shape, (o.shape, r.shape)
        np.testing.assert_array_equal(np.asarray(o), np.asarray(r))

    print("KERNEL_OK")
</pallas_src>

<mosaic_0001>
module attributes {stable_mosaic.version = 11 : i64} {
  func.func @kernel(%arg0: i32, %arg1: memref<2x1024xf32, #tpu.memory_space<vmem>>, %arg2: memref<2x512xf32, #tpu.memory_space<vmem>>, %arg3: memref<2x512xf32, #tpu.memory_space<vmem>>) attributes {dimension_semantics = [#tpu.dimension_semantics<parallel>], iteration_bounds = array<i64: 1>, scalar_prefetch = 0 : i64, scratch_operands = 0 : i64, tpu.core_type = #tpu.core_type<tc>, window_params = [{transform_indices = @transform_0, window_bounds = array<i64: 2, 1024>}, {transform_indices = @transform_1, window_bounds = array<i64: 2, 512>}, {transform_indices = @transform_2, window_bounds = array<i64: 2, 512>}]} {
    %c0 = arith.constant 0 : index
    %c0_0 = arith.constant 0 : index
    %0 = vector.load %arg1[%c0, %c0_0] : memref<2x1024xf32, #tpu.memory_space<vmem>>, vector<2x1024xf32>
    %1 = vector.extract_strided_slice %0 {offsets = [0, 0], sizes = [2, 512], strides = [1, 1]} : vector<2x1024xf32> to vector<2x512xf32>
    %c0_1 = arith.constant 0 : index
    %c0_2 = arith.constant 0 : index
    %2 = vector.load %arg2[%c0_1, %c0_2] : memref<2x512xf32, #tpu.memory_space<vmem>>, vector<2x512xf32>
    tpu.vector_store %arg2[%c0_1, %c0_2], %1 {strides = array<i32>} : memref<2x512xf32, #tpu.memory_space<vmem>>, vector<2x512xf32>,
    %3 = vector.extract_strided_slice %0 {offsets = [0, 512], sizes = [2, 512], strides = [1, 1]} : vector<2x1024xf32> to vector<2x512xf32>
    %c0_3 = arith.constant 0 : index
    %c0_4 = arith.constant 0 : index
    %4 = vector.load %arg3[%c0_3, %c0_4] : memref<2x512xf32, #tpu.memory_space<vmem>>, vector<2x512xf32>
    tpu.vector_store %arg3[%c0_3, %c0_4], %3 {strides = array<i32>} : memref<2x512xf32, #tpu.memory_space<vmem>>, vector<2x512xf32>,
    return
  }
  func.func @transform_0(%arg0: i32) -> (i32, i32) {
    %c0_i32 = arith.constant 0 : i32
    %c0_i32_0 = arith.constant 0 : i32
    return %arg0, %c0_i32 : i32, i32
  }
  func.func @transform_1(%arg0: i32) -> (i32, i32) {
    %c0_i32 = arith.constant 0 : i32
    %c0_i32_0 = arith.constant 0 : i32
    return %arg0, %c0_i32 : i32, i32
  }
  func.func @transform_2(%arg0: i32) -> (i32, i32) {
    %c0_i32 = arith.constant 0 : i32
    %c0_i32_0 = arith.constant 0 : i32
    return %arg0, %c0_i32 : i32, i32
  }
}

</mosaic_0001>

<bundles_post_ra>
// kernel: tpu_custom_call.1
= control target key start
LH: loop header
LB: loop body
LE: loop exit
PB: predicated region body
PF: predicated region fallthrough
CT: control target
= control target key end

     0   :  { %8 = vsyncpa [#allocation3], 0  ;;  %s186_s0 = inlined_call_operand.hbm [shape: f32[2,1024], index: 0, kind: input, shape index: {}]   ;;  %s187_s1 = inlined_call_operand.hbm [shape: f32[2,512], index: 1, kind: output, shape index: {0}]   ;;  %s188_s2 = inlined_call_operand.hbm [shape: f32[2,512], index: 2, kind: output, shape index: {1}]  }
   0x1   :  { %9 = vsyncpa [#allocation4], 0 }
   0x2   :  { %10 = vsyncpa [#allocation7], 0  ;;  %s132_s9 = smov [#allocation2]   ;;  %s60_s13 = scalar_lea.hbm %s186_s0, 256 }
   0x3   :  { %s17_s10 = sshll.u32 %s132_s9, 4  ;;  %p61_p0 = scmp.ne.s32.totalorder %s186_s0, %s60_s13  ;;  %s18_s10 = int_to_ptr.vmem [resolvable:$true] %s17_s10 }
   0x4   :  { %p64_p1 = scmp.lt.u32.totalorder %s60_s13, %s186_s0 }
   0x6   :  { %p66_p2 = pnand %p64_p1, %p61_p0 }
   0x8   :  { %69 = shalt.err (!%p66_p2)
}
   0x9   :  { %s70_s18 = scalar_lea.vmem %s18_s10, 256  ;;  %p75_p4 = scmp.lt.s32.totalorder %s18_s10, %s18_s10 }
   0xa   :  { %p71_p3 = scmp.ne.s32.totalorder %s18_s10, %s70_s18  ;;  %p76_p5 = scmp.lt.s32.totalorder %s70_s18, %s70_s18 }
   0xc   :  { %p77_p6 = por %p76_p5, %p75_p4 }
   0xe   :  { %p78_p7 = pnand %p77_p6, %p71_p3 }
  0x10   :  { %81 = shalt.err (!%p78_p7)
}
  0x11   :  { %20 = dma.hbm_to_vmem [thread:$0]  %s186_s0, 256, %s18_s10, [#allocation3]  }
  0x12   :  { %126 = dma.done.wait [#allocation3], 256  }
  0x13   :  { %127 = vsyncadd [#allocation3], 4294967040  ;;  %s133_s21 = smov [#allocation5]   ;;  %s134_s23 = smov [#allocation6]   ;;  %v24_v0 = vld [vmem:[#allocation2] sm:$0xff]  ;;  %v25_v1 = vld [vmem:[#allocation2 + $0x8] sm:$0xff] }
  0x14   :  { %s34_s22 = sshll.u32 %s133_s21, 4  ;;  %s44_s24 = sshll.u32 %s134_s23, 4  ;;  %26 = vst [vmem:[#allocation5] sm:$0xff] %v24_v0  ;;  %27 = vst [vmem:[#allocation6] sm:$0xff] %v25_v1  ;;  %s35_s22 = int_to_ptr.vmem [resolvable:$true] %s34_s22  ;;  %s45_s24 = int_to_ptr.vmem [resolvable:$true] %s44_s24 }
  0x15   :  { %s82_s25 = scalar_lea.vmem %s35_s22, 128  ;;  %p87_p9 = scmp.lt.s32.totalorder %s35_s22, %s35_s22 }
  0x16   :  { %p83_p8 = scmp.ne.s32.totalorder %s35_s22, %s82_s25  ;;  %p88_p10 = scmp.lt.s32.totalorder %s82_s25, %s82_s25 }
  0x18   :  { %p89_p11 = por %p88_p10, %p87_p9 }
  0x1a   :  { %p90_p12 = pnand %p89_p11, %p83_p8 }
  0x1c   :  { %93 = shalt.err (!%p90_p12)
}
  0x1d   :  { %s94_s27 = scalar_lea.hbm %s187_s1, 128 }
  0x1e   :  { %p95_p13 = scmp.ne.s32.totalorder %s187_s1, %s94_s27  ;;  %p98_p0 = scmp.lt.u32.totalorder %s94_s27, %s187_s1 }
  0x20   :  { %p100_p1 = pnand %p98_p0, %p95_p13 }
  0x22   :  { %103 = shalt.err (!%p100_p1)
}
  0x23   :  { %37 = dma.vmem_to_hbm [thread:$0]  %s35_s22, 128, %s187_s1, [#allocation4]  }
  0x24   :  { %s104_s6 = scalar_lea.vmem %s45_s24, 128  ;;  %p109_p3 = scmp.lt.s32.totalorder %s45_s24, %s45_s24 }
  0x25   :  { %p105_p2 = scmp.ne.s32.totalorder %s45_s24, %s104_s6  ;;  %p110_p4 = scmp.lt.s32.totalorder %s104_s6, %s104_s6 }
  0x27   :  { %p111_p5 = por %p110_p4, %p109_p3 }
  0x29   :  { %p112_p6 = pnand %p111_p5, %p105_p2 }
  0x2b   :  { %115 = shalt.err (!%p112_p6)
}
  0x2c   :  { %s116_s9 = scalar_lea.hbm %s188_s2, 128 }
  0x2d   :  { %p117_p7 = scmp.ne.s32.totalorder %s188_s2, %s116_s9  ;;  %p120_p8 = scmp.lt.u32.totalorder %s116_s9, %s188_s2 }
  0x2f   :  { %p122_p9 = pnand %p120_p8, %p117_p7 }
  0x31   :  { %125 = shalt.err (!%p122_p9)
}
  0x32   :  { %47 = dma.vmem_to_hbm [thread:$0]  %s45_s24, 128, %s188_s2, [#allocation7]  }
  0x33   :  { %128 = dma.done.wait [#allocation4], 128  }
  0x34   :  { %129 = vsyncadd [#allocation4], 4294967168 }
  0x35   :  { %130 = dma.done.wait [#allocation7], 128  }
  0x36   :  { %131 = vsyncadd [#allocation7], 4294967168 }
  0x37   :  { %54 = vsyncpa [#allocation3], 1 }
  0x38   :  { %55 = vsyncpa [#allocation4], 1 }
  0x39   :  { %56 = vsyncpa [#allocation7], 1 }

</bundles_post_ra>
